<compile_context>
chip_gen: v5e
topology: v5e:2x2
jax: 0.10.0
libtpu: 0.0.40
codegen_flags: <defaults>
</compile_context>

<pallas_src>
import functools

import jax
import jax.numpy as jnp
from jax.experimental import pallas as pl
from jax.experimental.pallas import tpu as pltpu


# ---------------------------------------------------------------------------
# kernel
# ---------------------------------------------------------------------------
def _rope_kernel(cos_ref, sin_p1_ref, sin_m1_ref, x_ref, o_ref):
    """cos/sin_p1/sin_m1: (TL, W) packed tables in the compute dtype.
    x_ref / o_ref: (TBH, TL, W) activation tiles in the I/O dtype.

    sin_p1 multiplies roll(x, +1) and sin_m1 multiplies roll(x, W-1); the
    wrapper orders the two tables to match the hardware roll convention.
    """
    x_raw = x_ref[...]
    w = x_raw.shape[-1]
    lane_axis = x_raw.ndim - 1

    # Roll the raw tile (pre-upcast): packed bf16 halves the XLU vrot pushes.
    r_p1 = pltpu.roll(x_raw, 1, lane_axis)
    r_m1 = pltpu.roll(x_raw, w - 1, lane_axis)

    cdt = cos_ref.dtype
    cos = cos_ref[...][None, :, :]
    s_p1 = sin_p1_ref[...][None, :, :]
    s_m1 = sin_m1_ref[...][None, :, :]
    out = (cos * x_raw.astype(cdt)
           + s_p1 * r_p1.astype(cdt)
           + s_m1 * r_m1.astype(cdt))
    o_ref[...] = out.astype(o_ref.dtype)


# ---------------------------------------------------------------------------
# roll-convention probe (runs once, eagerly, on concrete data)
# ---------------------------------------------------------------------------
@functools.lru_cache(maxsize=None)
def _roll_plus1_is_prev():
    """True iff pltpu.roll(x, 1, axis)[j] == x[j-1] (np.roll convention)."""
    def probe(x_ref, o_ref):
        o_ref[...] = pltpu.roll(x_ref[...], 1, 1)

    x = jnp.tile(jnp.arange(128, dtype=jnp.float32), (8, 1))
    out = pl.pallas_call(
        probe, out_shape=jax.ShapeDtypeStruct((8, 128), jnp.float32))(x)
    return bool(out[0, 1] == 0.0)


# ---------------------------------------------------------------------------
# tiling helpers
# ---------------------------------------------------------------------------
def _pick_seq_tile(n, cap, align):
    """Returns (tile, padded_n): rows per block (<= cap, sublane-aligned unless
    it spans the whole axis) and a padded row count that is a multiple of it."""
    if n <= max(cap, align):
        return n, n                           # full-extent block: always legal
    cap = max(align, (cap // align) * align)
    t = cap
    while t >= align:                         # largest aligned divisor of n
        if n % t == 0:
            return t, n
        t -= align
    # No aligned divisor <= cap: pad the tail instead of taking a full-extent
    # block (which could blow VMEM for long sequences, worst on v7x's 64 MiB).
    return cap, pl.cdiv(n, cap) * cap


def _pick_div(n, cap):
    """Largest divisor of n that is <= cap."""
    cap = max(1, min(n, cap))
    for t in range(cap, 0, -1):
        if n % t == 0:
            return t
    return 1


# ---------------------------------------------------------------------------
# wrapper
# ---------------------------------------------------------------------------
def rotary_embedding(x, theta=10000.0, *, compute_dtype=None,
                     seq_tile_cap=1024, block_bytes=4 << 20,
                     donate_input=False):
    """Applies RoPE along the last dim of x (B, H, L, D); positions run along L.

    compute_dtype: dtype of the in-kernel math / cos-sin tables.  Defaults to
      float32 (exact).  Pass jnp.bfloat16 for bf16 activations on v6e / v7x to
      halve VALU work (the op stays memory-bound).
    donate_input: alias x's buffer to the output (caller must not reuse x).
    """
    B, H, L, D = x.shape
    assert D % 2 == 0, "head dim must be even"
    BH = B * H
    itemsize = jnp.dtype(x.dtype).itemsize
    compute_dtype = jnp.float32 if compute_dtype is None else jnp.dtype(compute_dtype)

    # ---- lane-dense packing: fold R consecutive positions into one 128-lane row
    if D % 128 == 0:
        R = 1
    elif 128 % D == 0:
        R = 128 // D
    else:
        R = 1  # TODO(synk): pad head dim to a lane multiple for awkward D values
    W = R * D

    # ---- sequence tiling (pad L so it folds into full rows and full tiles)
    Lr = pl.cdiv(L, R)
    sub_align = max(8, 32 // itemsize)          # 8 (f32), 16 (bf16), 32 (int8)
    tl, Lr_pad = _pick_seq_tile(Lr, seq_tile_cap, sub_align)
    L_pad = Lr_pad * R

    x3 = x.reshape(BH, L, D)
    if L_pad != L:
        # Zero-pad the tail; RoPE has no cross-position coupling, sliced off below.
        x3 = jnp.pad(x3, ((0, 0), (0, L_pad - L), (0, 0)))
    xf = x3.reshape(BH, Lr_pad, W)              # contiguous view when no padding

    # ---- cos / sin tables in the packed layout, sign + pair-mask baked in.
    # sin_prev is nonzero on odd lanes (+sin_m at 2m+1), sin_next on even lanes
    # (-sin_m at 2m); together with the two lane rolls they implement the
    # interleaved rotation with no select and no iota in the kernel.  The
    # zero-masked lanes also kill any wraparound across row/position borders.
    pos = jnp.arange(L_pad, dtype=jnp.float32)
    freqs = theta ** (-jnp.arange(0, D, 2, dtype=jnp.float32) / D)        # (D/2,)
    ang = pos[:, None] * freqs[None, :]                                   # (L_pad, D/2)
    cos_h, sin_h = jnp.cos(ang), jnp.sin(ang)
    zeros = jnp.zeros_like(sin_h)
    cos_t = jnp.repeat(cos_h, 2, axis=-1)                                 # [c0,c0,c1,c1,..]
    sin_prev = jnp.stack([zeros, sin_h], axis=-1).reshape(L_pad, D)       # [0,+s0,0,+s1,..]
    sin_next = jnp.stack([-sin_h, zeros], axis=-1).reshape(L_pad, D)      # [-s0,0,-s1,0,..]
    cos_p = cos_t.reshape(Lr_pad, W).astype(compute_dtype)
    sin_prev_p = sin_prev.reshape(Lr_pad, W).astype(compute_dtype)
    sin_next_p = sin_next.reshape(Lr_pad, W).astype(compute_dtype)
    # Pair each table with the rotation direction the hardware actually uses.
    if _roll_plus1_is_prev():
        t_p1, t_m1 = sin_prev_p, sin_next_p
    else:
        t_p1, t_m1 = sin_next_p, sin_prev_p

    # ---- head tiling: ~block_bytes per x block
    row_bytes = W * itemsize
    tbh = _pick_div(BH, max(1, block_bytes // (tl * row_bytes)))
    seq_tiles = Lr_pad // tl
    if seq_tiles == 1 and BH // tbh == 1 and BH > 1:
        tbh = _pick_div(BH, max(1, BH // 2))    # >=2 grid steps: both v7x TCs get work
    bh_tiles = BH // tbh

    # Head axis innermost so each cos/sin tile is fetched once and reused across
    # all heads; for single-seq-tile inputs lead with the head axis instead so
    # the megacore-sharded leading axis has >= 2 steps.
    if seq_tiles >= 2 or bh_tiles == 1:
        grid = (seq_tiles, bh_tiles)
        tab_map = lambda lt, bt: (lt, 0)
        x_map = lambda lt, bt: (bt, lt, 0)
    else:
        grid = (bh_tiles, seq_tiles)
        tab_map = lambda bt, lt: (lt, 0)
        x_map = lambda bt, lt: (bt, lt, 0)

    # ---- VMEM budget: double-buffered (in + out) blocks + double-buffered tables
    tab_itemsize = jnp.dtype(compute_dtype).itemsize
    x_block_bytes = tbh * tl * W * itemsize
    tab_block_bytes = tl * W * tab_itemsize
    vmem_limit = 2 * 2 * x_block_bytes + 2 * 3 * tab_block_bytes + (4 << 20)
    vmem_limit = int(max(vmem_limit, 20 << 20))

    cost = pl.CostEstimate(
        flops=5 * BH * L_pad * D,               # 3 mul + 2 add per element
        transcendentals=0,
        bytes_accessed=2 * xf.size * itemsize + 3 * Lr_pad * W * tab_itemsize)

    out = pl.pallas_call(
        _rope_kernel,
        out_shape=jax.ShapeDtypeStruct((BH, Lr_pad, W), x.dtype),
        grid=grid,
        in_specs=[
            pl.BlockSpec((tl, W), tab_map),          # cos
            pl.BlockSpec((tl, W), tab_map),          # sin paired with roll(+1)
            pl.BlockSpec((tl, W), tab_map),          # sin paired with roll(W-1)
            pl.BlockSpec((tbh, tl, W), x_map),       # x
        ],
        out_specs=pl.BlockSpec((tbh, tl, W), x_map),
        compiler_params=pltpu.CompilerParams(
            dimension_semantics=("parallel", "parallel"),
            vmem_limit_bytes=vmem_limit),
        cost_estimate=cost,
        input_output_aliases=({3: 0} if donate_input else {}),
    )(cos_p, t_p1, t_m1, xf)

    out = out.reshape(BH, L_pad, D)
    if L_pad != L:
        out = out[:, :L, :]
    return out.reshape(B, H, L, D)


# ---------------------------------------------------------------------------
# pure-JAX reference (mirrors the torch module exactly, f32 math)
# ---------------------------------------------------------------------------
def rope_ref(x, theta=10000.0):
    B, H, L, D = x.shape
    freqs = theta ** (-jnp.arange(0, D, 2, dtype=jnp.float32) / D)
    ang = jnp.arange(L, dtype=jnp.float32)[:, None] * freqs[None, :]      # (L, D/2)
    cos, sin = jnp.cos(ang), jnp.sin(ang)
    x2 = x.astype(jnp.float32).reshape(B, H, L, D // 2, 2)
    x0, x1 = x2[..., 0], x2[..., 1]
    o0 = cos * x0 - sin * x1
    o1 = sin * x0 + cos * x1
    return jnp.stack([o0, o1], axis=-1).reshape(B, H, L, D)


if __name__ == "__main__":
    key = jax.random.PRNGKey(0)

    # (batch, heads, seq, head_dim); D=64 as in the module docstring.
    B, H, L, D = 2, 4, 16, 64
    x = jax.random.normal(key, (B, H, L, D), dtype=jnp.float32)

    # f32 path: exact (no MXU, no low-precision swap) -> tight tolerance.
    out = jax.block_until_ready(rotary_embedding(x))
    assert out.shape == x.shape and out.dtype == x.dtype
    err = float(jnp.max(jnp.abs(out - rope_ref(x))))
    if not err < 1e-5:
        raise AssertionError(f"f32 mismatch vs reference, max abs err = {err}")

    # bf16 I/O, f32 compute (default): halves HBM bytes, math still f32-exact.
    xb = x.astype(jnp.bfloat16)
    outb = jax.block_until_ready(rotary_embedding(xb))
    assert outb.shape == x.shape and outb.dtype == jnp.bfloat16
    errb = float(jnp.max(jnp.abs(outb.astype(jnp.float32) - rope_ref(xb))))
    if not errb < 5e-2:
        raise AssertionError(f"bf16 mismatch vs reference, max abs err = {errb}")

    # bf16 I/O + bf16 compute (v6e/v7x fast path): halves VALU/XLU work too.
    outbb = jax.block_until_ready(rotary_embedding(xb, compute_dtype=jnp.bfloat16))
    errbb = float(jnp.max(jnp.abs(outbb.astype(jnp.float32) - rope_ref(xb))))
    if not errbb < 1.5e-1:
        raise AssertionError(f"bf16-compute mismatch vs reference, max abs err = {errbb}")

    # Awkward shape: L not a multiple of 128//D -> exercises the padding path
    # and the short-sequence (head-leading) grid.
    x_odd = jax.random.normal(jax.random.PRNGKey(1), (1, 2, 10, 32), dtype=jnp.float32)
    out_odd = jax.block_until_ready(rotary_embedding(x_odd))
    err_odd = float(jnp.max(jnp.abs(out_odd - rope_ref(x_odd))))
    if not err_odd < 1e-5:
        raise AssertionError(f"padded-L mismatch vs reference, max abs err = {err_odd}")

    print("KERNEL_OK")
</pallas_src>

<mosaic_0001>
module attributes {stable_mosaic.version = 11 : i64} {
  func.func @probe(%arg0: memref<8x128xf32, #tpu.memory_space<vmem>>, %arg1: memref<8x128xf32, #tpu.memory_space<vmem>>) attributes {dimension_semantics = [], scalar_prefetch = 0 : i64, scratch_operands = 0 : i64, tpu.core_type = #tpu.core_type<tc>} {
    %c0 = arith.constant 0 : index
    %c0_0 = arith.constant 0 : index
    %0 = vector.load %arg0[%c0, %c0_0] : memref<8x128xf32, #tpu.memory_space<vmem>>, vector<8x128xf32>
    %c1_i32 = arith.constant 1 : i32
    %1 = tpu.dynamic_rotate %0 by %c1_i32 dim 1 : vector<8x128xf32>, i32 -> vector<8x128xf32>
    %c0_1 = arith.constant 0 : index
    %c0_2 = arith.constant 0 : index
    %2 = vector.load %arg1[%c0_1, %c0_2] : memref<8x128xf32, #tpu.memory_space<vmem>>, vector<8x128xf32>
    tpu.vector_store %arg1[%c0_1, %c0_2], %1 {strides = array<i32>} : memref<8x128xf32, #tpu.memory_space<vmem>>, vector<8x128xf32>,
    return
  }
}

</mosaic_0001>

<bundles_post_ra>
// kernel: tpu_custom_call.1
= control target key start
LH: loop header
LB: loop body
LE: loop exit
PB: predicated region body
PF: predicated region fallthrough
CT: control target
= control target key end

     0   :  { %6 = vsyncpa [#allocation3], 0  ;;  %s118_s0 = inlined_call_operand.hbm [shape: f32[8,128], index: 0, kind: input, shape index: {}]   ;;  %s119_s1 = inlined_call_operand.hbm [shape: f32[8,128], index: 1, kind: output, shape index: {}]  }
   0x1   :  { %7 = vsyncpa [#allocation4], 0  ;;  %s13_s8 = sshll.u32 %s118_s0, 4  ;;  %s99_s9 = smov [#allocation2]   ;;  %s14_s8 = int_to_ptr.hbm [resolvable:$true] %s13_s8 }
   0x2   :  { %s15_s10 = sshll.u32 %s99_s9, 4  ;;  %s16_s10 = int_to_ptr.vmem [resolvable:$true] %s15_s10 }
   0x3   :  { %18 = dma.hbm_to_vmem [thread:$0]  %s14_s8, 128, %s16_s10, [#allocation3]  }
   0x4   :  { %95 = dma.done.wait [#allocation3], 128  }
   0x5   :  { %96 = vsyncadd [#allocation3], 4294967168  ;;  %v23_v0 = vld [vmem:[#allocation2] sm:$0xff]  ;;  %s100_s11 = smov 1   ;;  %s101_s12 = smov [#allocation5]  }
   0x6   :  { %24 = vrot.lane.b32.xlu0 %v23_v0, %s100_s11  ;;  %s32_s13 = sshll.u32 %s101_s12, 4  ;;  %s34_s16 = sshll.u32 %s119_s1, 4  ;;  %s33_s13 = int_to_ptr.vmem [resolvable:$true] %s32_s13  ;;  %s35_s16 = int_to_ptr.hbm [resolvable:$true] %s34_s16 }
  0x78   :  { %v25_v1 = vpop.permute.xlu0 %24 }
  0x79   :  { %26 = vst [vmem:[#allocation5] sm:$0xff] %v25_v1 }
  0x7a   :  { %37 = dma.vmem_to_hbm [thread:$0]  %s33_s13, 128, %s35_s16, [#allocation4]  }
  0x7b   :  { %97 = dma.done.wait [#allocation4], 128  }
  0x7c   :  { %98 = vsyncadd [#allocation4], 4294967168 }
  0x7d   :  { %42 = vsyncpa [#allocation3], 1 }
  0x7e   :  { %43 = vsyncpa [#allocation4], 1 }

</bundles_post_ra>
